<compile_context>
chip_gen: v7x
topology: tpu7x:2x2x1
jax: 0.10.0
libtpu: 0.0.40
codegen_flags: <defaults>
</compile_context>

<pallas_src>
import functools

import jax
import jax.numpy as jnp
from jax import lax
from jax.experimental import pallas as pl
from jax.experimental.pallas import tpu as pltpu


# --------------------------- single-block fast path ---------------------------

def _batchnorm_kernel(x_ref, o_ref, *, subtract_mean: bool, eps: float):
    # Block is (N, TILE_D): the full batch, a lane-dense slice of features.
    n = x_ref.shape[0]
    if subtract_mean:
        # f32 accumulation without materializing an N x TILE_D f32 copy of the
        # block; (x - mean) is recomputed in the store expression rather than
        # carried across the rsqrt as a VMEM temporary.
        mean = jnp.mean(x_ref[...], axis=0, keepdims=True, dtype=jnp.float32)
        xc = x_ref[...] - mean                      # promotes to f32 (mean is f32)
        # Bessel correction, as in BatchNorm._descale.
        m2 = jnp.mean(xc * xc, axis=0, keepdims=True) * (n / (n - 1))
        inv = lax.rsqrt(m2 + eps)                   # (1, TILE_D)
        # Single full-block, lane-dense store; subtract is recomputed (free in
        # this mem-bound kernel) instead of reloading a persisted xc buffer.
        o_ref[...] = ((x_ref[...] - mean) * inv).astype(o_ref.dtype)
    else:
        m2 = jnp.mean(jnp.square(x_ref[...].astype(jnp.float32)),
                      axis=0, keepdims=True)
        inv = lax.rsqrt(m2 + eps)
        o_ref[...] = (x_ref[...] * inv).astype(o_ref.dtype)


def _vmem_budgets() -> tuple[int, int]:
    """(tile-sizing budget, scoped vmem limit), generation-aware.

    v5e/v6e have 128 MiB physical VMEM per TensorCore, v7x has 64 MiB.  The
    budget is what the tile picker sizes the double-buffered working set
    against; the scoped limit handed to Mosaic is larger (headroom) but stays
    under physical VMEM, so a shape that passes the picker also compiles.
    """
    try:
        cap = int(pltpu.get_tpu_info().vmem_capacity_bytes)
    except Exception:
        cap = 64 * 1024 * 1024  # conservative default (v7x-sized)
    if cap >= 100 * 1024 * 1024:          # v5e / v6e (128 MiB)
        return 72 * 1024 * 1024, 100 * 1024 * 1024
    return 28 * 1024 * 1024, 48 * 1024 * 1024   # v7x (64 MiB) or unknown


def _pick_tile_d(n: int, d: int, itemsize: int, vmem_budget_bytes: int) -> int:
    """Largest lane-dense TILE_D whose per-step working set fits the budget.

    Per grid step, roughly:
      2 x N x TILE_D x itemsize   (double-buffered input)
    + 2 x N x TILE_D x itemsize   (double-buffered output)
    + 1 x N x TILE_D x 4          (f32 in-flight working headroom)
    Returns 0 if even one lane-dense column block of the full batch does not
    fit -> caller falls back to the two-pass accumulator path.
    """
    per_col = n * (4 * itemsize + 4)
    max_cols = vmem_budget_bytes // max(per_col, 1)
    if max_cols < min(d, 128):
        return 0
    if d <= 128 or max_cols >= d:
        tile_d = d
    else:
        tile_d = (max_cols // 128) * 128
    # Keep >=2 (>=4 for larger D) grid steps so double-buffering overlaps DMA
    # with compute and the "parallel" D axis feeds both v7x TensorCores.
    if d >= 512:
        min_tiles = 4
    elif d >= 256:
        min_tiles = 2
    else:
        min_tiles = 1
    if min_tiles > 1:
        target = pl.cdiv(pl.cdiv(d, min_tiles), 128) * 128
        tile_d = min(tile_d, max(target, 128))
    return min(tile_d, d)


# --------------------------- two-pass large-N fallback ---------------------------

def _stats_kernel(x_ref, sum_ref, sq_ref, *, n_total: int, tile_n: int):
    ni = pl.program_id(1)

    @pl.when(ni == 0)
    def _():
        sum_ref[...] = jnp.zeros_like(sum_ref)
        sq_ref[...] = jnp.zeros_like(sq_ref)

    x = x_ref[...].astype(jnp.float32)
    if n_total % tile_n != 0:
        rows = lax.broadcasted_iota(jnp.int32, x.shape, 0) + ni * tile_n
        x = jnp.where(rows < n_total, x, 0.0)
    sum_ref[...] += jnp.sum(x, axis=0, keepdims=True)
    sq_ref[...] += jnp.sum(x * x, axis=0, keepdims=True)


def _normalize_kernel(x_ref, mean_ref, inv_ref, o_ref):
    o_ref[...] = ((x_ref[...] - mean_ref[...]) * inv_ref[...]).astype(o_ref.dtype)


def _batch_norm_two_pass(x, *, subtract_mean, eps, tile_d, tile_n, vmem_limit):
    n, d = x.shape
    itemsize = jnp.dtype(x.dtype).itemsize
    if tile_d is None:
        tile_d = d if d <= 512 else 512
    tile_d = min(tile_d, d)
    if tile_d < d:
        assert tile_d % 128 == 0, "partial feature tiles must be lane-dense (x128)"
    if tile_n is None:
        tile_n = n if n <= 1024 else 1024
    tile_n = min(tile_n, n)
    if tile_n < n:
        assert tile_n % 8 == 0, "partial batch tiles must be sublane-dense (x8)"

    d_tiles = pl.cdiv(d, tile_d)
    n_tiles = pl.cdiv(n, tile_n)

    col_sum, col_sq = pl.pallas_call(
        functools.partial(_stats_kernel, n_total=n, tile_n=tile_n),
        out_shape=(jax.ShapeDtypeStruct((1, d), jnp.float32),
                   jax.ShapeDtypeStruct((1, d), jnp.float32)),
        grid=(d_tiles, n_tiles),
        in_specs=[pl.BlockSpec((tile_n, tile_d), lambda j, i: (i, j))],
        out_specs=(pl.BlockSpec((1, tile_d), lambda j, i: (0, j)),
                   pl.BlockSpec((1, tile_d), lambda j, i: (0, j))),
        compiler_params=pltpu.CompilerParams(
            dimension_semantics=("parallel", "arbitrary"),
            vmem_limit_bytes=vmem_limit),
        cost_estimate=pl.CostEstimate(
            flops=3 * n * d, transcendentals=0,
            bytes_accessed=n * d * itemsize + 8 * d),
    )(x)

    nf = jnp.float32(n)
    mean = col_sum / nf
    if subtract_mean:
        # TODO(synk): uncentered E[x^2] - mean^2 rewrite differs slightly (f32
        # rounding) from the module's centered form; only used when the full
        # batch cannot fit VMEM.
        m2 = (col_sq / nf - mean * mean) * (n / (n - 1))
    else:
        mean = jnp.zeros_like(mean)
        m2 = col_sq / nf
    inv = lax.rsqrt(m2 + eps)

    return pl.pallas_call(
        _normalize_kernel,
        out_shape=jax.ShapeDtypeStruct((n, d), x.dtype),
        grid=(n_tiles, d_tiles),
        in_specs=[pl.BlockSpec((tile_n, tile_d), lambda i, j: (i, j)),
                  pl.BlockSpec((1, tile_d), lambda i, j: (0, j)),
                  pl.BlockSpec((1, tile_d), lambda i, j: (0, j))],
        out_specs=pl.BlockSpec((tile_n, tile_d), lambda i, j: (i, j)),
        compiler_params=pltpu.CompilerParams(
            dimension_semantics=("parallel", "parallel"),
            vmem_limit_bytes=vmem_limit),
        cost_estimate=pl.CostEstimate(
            flops=2 * n * d, transcendentals=0,
            bytes_accessed=2 * n * d * itemsize),
    )(x, mean, inv)


# ------------------------------- public wrapper -------------------------------

def batch_norm(
    x: jax.Array,
    *,
    subtract_mean: bool = True,
    eps: float = 1e-7,
    tile_d: int | None = None,
    tile_n: int | None = None,
    force_two_pass: bool = False,
) -> jax.Array:
    """Pallas implementation of BatchNorm.forward (no running stats)."""
    assert x.ndim == 2, "expected (batch, dim) input"
    n, d = x.shape
    if subtract_mean:
        assert n >= 2

    itemsize = jnp.dtype(x.dtype).itemsize
    budget, vmem_limit = _vmem_budgets()

    if tile_d is None:
        picked = _pick_tile_d(n, d, itemsize, budget)
    else:
        picked = min(tile_d, d)
        if picked < d:
            assert picked % 128 == 0, "partial feature tiles must be lane-dense (x128)"

    if force_two_pass or picked == 0:
        # Full batch does not fit VMEM for even one lane-dense column block:
        # two-pass accumulator reduction over an inner N grid axis.
        return _batch_norm_two_pass(
            x, subtract_mean=subtract_mean, eps=eps,
            tile_d=tile_d, tile_n=tile_n, vmem_limit=vmem_limit)

    td = picked
    grid = (pl.cdiv(d, td),)
    kernel = functools.partial(_batchnorm_kernel,
                               subtract_mean=subtract_mean, eps=eps)
    return pl.pallas_call(
        kernel,
        out_shape=jax.ShapeDtypeStruct((n, d), x.dtype),
        grid=grid,
        in_specs=[pl.BlockSpec((n, td), lambda j: (0, j))],
        out_specs=pl.BlockSpec((n, td), lambda j: (0, j)),
        compiler_params=pltpu.CompilerParams(
            # Feature tiles are independent -> shard across TCs on v7x.
            dimension_semantics=("parallel",),
            vmem_limit_bytes=vmem_limit,
        ),
        cost_estimate=pl.CostEstimate(
            flops=(6 if subtract_mean else 4) * n * d,
            transcendentals=d,
            bytes_accessed=2 * n * d * itemsize),
    )(x)


def _reference(x, *, subtract_mean=True, eps=1e-7):
    x32 = x.astype(jnp.float32)
    n = x32.shape[0]
    if subtract_mean:
        mean = jnp.mean(x32, axis=0)
        xc = x32 - mean
        m2 = jnp.mean(xc * xc, axis=0) * (n / (n - 1))
    else:
        xc = x32
        m2 = jnp.mean(x32 * x32, axis=0)
    return (xc * lax.rsqrt(m2 + eps)).astype(x.dtype)


if __name__ == "__main__":
    key = jax.random.PRNGKey(0)

    # Module was constructed as BatchNorm(dim=32); input is (batch=8, dim=32).
    # NOTE: D=32 (<128 lanes) is launch-overhead dominated; real deployments
    # should present lane-dense (>=128-wide) feature slabs (pack feature groups
    # or transpose in the caller before invoking the kernel).
    batch, dim = 8, 32
    x = jax.random.normal(key, (batch, dim), dtype=jnp.float32)

    # Buffers from __init__ (unused in the default forward path,
    # track_and_use_running_stats=False).
    running_second_moment = jnp.ones((dim,), dtype=jnp.float32)
    running_first_moment = jnp.zeros((dim,), dtype=jnp.float32)
    num_batches_tracked = jnp.zeros((1,), dtype=jnp.int32)

    out = jax.block_until_ready(batch_norm(x, subtract_mean=True, eps=1e-7))
    ref = _reference(x, subtract_mean=True, eps=1e-7)
    assert out.shape == x.shape and out.dtype == x.dtype
    assert jnp.allclose(out, ref, atol=1e-5, rtol=1e-5), "mismatch vs reference"

    # Tiled fast path (multiple lane-dense feature blocks).
    x2 = jax.random.normal(jax.random.PRNGKey(1), (16, 384), dtype=jnp.float32)
    out2 = jax.block_until_ready(batch_norm(x2, tile_d=128))
    ref2 = _reference(x2)
    assert jnp.allclose(out2, ref2, atol=1e-5, rtol=1e-5), "tiled mismatch"

    # Auto-picked tiling + subtract_mean=False path.
    out3 = jax.block_until_ready(batch_norm(x2, subtract_mean=False))
    ref3 = _reference(x2, subtract_mean=False)
    assert jnp.allclose(out3, ref3, atol=1e-5, rtol=1e-5), "no-mean mismatch"

    # Two-pass accumulator fallback (large-N shapes), forced at a small shape.
    x4 = jax.random.normal(jax.random.PRNGKey(2), (24, 256), dtype=jnp.float32)
    out4 = jax.block_until_ready(
        batch_norm(x4, force_two_pass=True, tile_d=128, tile_n=8))
    ref4 = _reference(x4)
    assert jnp.allclose(out4, ref4, atol=1e-4, rtol=1e-4), "two-pass mismatch"

    print("KERNEL_OK")
</pallas_src>

<mosaic_0001>
module attributes {stable_mosaic.version = 11 : i64} {
  func.func @_batchnorm_kernel(%arg0: i32, %arg1: memref<8x32xf32, #tpu.memory_space<vmem>>, %arg2: memref<8x32xf32, #tpu.memory_space<vmem>>) attributes {dimension_semantics = [#tpu.dimension_semantics<parallel>], iteration_bounds = array<i64: 1>, scalar_prefetch = 0 : i64, scratch_operands = 0 : i64, tpu.core_type = #tpu.core_type<tc>, window_params = [{transform_indices = @transform_0, window_bounds = array<i64: 8, 32>}, {transform_indices = @transform_1, window_bounds = array<i64: 8, 32>}]} {
    %c0 = arith.constant 0 : index
    %c0_0 = arith.constant 0 : index
    %0 = vector.load %arg1[%c0, %c0_0] : memref<8x32xf32, #tpu.memory_space<vmem>>, vector<8x32xf32>
    %cst = arith.constant dense<0.000000e+00> : vector<32xf32>
    %1 = vector.multi_reduction <add>, %0, %cst [0] : vector<8x32xf32> to vector<32xf32>
    %2 = vector.shape_cast %1 : vector<32xf32> to vector<1x32xf32>
    %cst_1 = arith.constant 8.000000e+00 : f32
    %3 = vector.broadcast %cst_1 : f32 to vector<1x32xf32>
    %4 = arith.divf %2, %3 : vector<1x32xf32>
    %c0_2 = arith.constant 0 : index
    %c0_3 = arith.constant 0 : index
    %5 = vector.load %arg1[%c0_2, %c0_3] : memref<8x32xf32, #tpu.memory_space<vmem>>, vector<8x32xf32>
    %6 = vector.broadcast %4 : vector<1x32xf32> to vector<8x32xf32>
    %7 = arith.subf %5, %6 : vector<8x32xf32>
    %8 = arith.mulf %7, %7 : vector<8x32xf32>
    %cst_4 = arith.constant dense<0.000000e+00> : vector<32xf32>
    %9 = vector.multi_reduction <add>, %8, %cst_4 [0] : vector<8x32xf32> to vector<32xf32>
    %10 = vector.shape_cast %9 : vector<32xf32> to vector<1x32xf32>
    %cst_5 = arith.constant 8.000000e+00 : f32
    %11 = vector.broadcast %cst_5 : f32 to vector<1x32xf32>
    %12 = arith.divf %10, %11 : vector<1x32xf32>
    %cst_6 = arith.constant 1.14285719 : f32
    %13 = vector.broadcast %cst_6 : f32 to vector<1x32xf32>
    %14 = arith.mulf %12, %13 : vector<1x32xf32>
    %cst_7 = arith.constant 1.000000e-07 : f32
    %15 = vector.broadcast %cst_7 : f32 to vector<1x32xf32>
    %16 = arith.addf %14, %15 : vector<1x32xf32>
    %17 = math.rsqrt %16 : vector<1x32xf32>
    %c0_8 = arith.constant 0 : index
    %c0_9 = arith.constant 0 : index
    %18 = vector.load %arg1[%c0_8, %c0_9] : memref<8x32xf32, #tpu.memory_space<vmem>>, vector<8x32xf32>
    %19 = vector.broadcast %4 : vector<1x32xf32> to vector<8x32xf32>
    %20 = arith.subf %18, %19 : vector<8x32xf32>
    %21 = vector.broadcast %17 : vector<1x32xf32> to vector<8x32xf32>
    %22 = arith.mulf %20, %21 : vector<8x32xf32>
    %c0_10 = arith.constant 0 : index
    %c0_11 = arith.constant 0 : index
    %23 = vector.load %arg2[%c0_10, %c0_11] : memref<8x32xf32, #tpu.memory_space<vmem>>, vector<8x32xf32>
    tpu.vector_store %arg2[%c0_10, %c0_11], %22 {strides = array<i32>} : memref<8x32xf32, #tpu.memory_space<vmem>>, vector<8x32xf32>,
    return
  }
  func.func @transform_0(%arg0: i32) -> (i32, i32) {
    %c0_i32 = arith.constant 0 : i32
    %c0_i32_0 = arith.constant 0 : i32
    return %c0_i32, %arg0 : i32, i32
  }
  func.func @transform_1(%arg0: i32) -> (i32, i32) {
    %c0_i32 = arith.constant 0 : i32
    %c0_i32_0 = arith.constant 0 : i32
    return %c0_i32, %arg0 : i32, i32
  }
}

</mosaic_0001>

<bundles_post_ra>
// kernel: tpu_custom_call.1
= control target key start
LH: loop header
LB: loop body
LE: loop exit
PB: predicated region body
PF: predicated region fallthrough
CT: control target
= control target key end

     0   :  { %6 = vsyncpa [#allocation3], 0  ;;  %s153_s0 = inlined_call_operand.hbm [shape: f32[8,32], index: 0, kind: input, shape index: {}]   ;;  %s154_s1 = inlined_call_operand.hbm [shape: f32[8,32], index: 1, kind: output, shape index: {}]  }
   0x1   :  { %7 = vsyncpa [#allocation4], 0  ;;  %s114_s6 = smov [#allocation2]   ;;  %s66_s10 = scalar_lea.hbm %s153_s0, 128 }
   0x2   :  { %s14_s7 = sshll.u32 %s114_s6, 4  ;;  %p67_p0 = scmp.ne.s32.totalorder %s153_s0, %s66_s10  ;;  %s15_s7 = int_to_ptr.vmem [resolvable:$true] %s14_s7 }
   0x3   :  { %p70_p1 = scmp.lt.u32.totalorder %s66_s10, %s153_s0 }
   0x5   :  { %p72_p2 = pnand %p70_p1, %p67_p0 }
   0x7   :  { %75 = shalt.err (!%p72_p2)
}
   0x8   :  { %s76_s15 = scalar_lea.vmem %s15_s7, 128  ;;  %p81_p4 = scmp.lt.s32.totalorder %s15_s7, %s15_s7 }
   0x9   :  { %p77_p3 = scmp.ne.s32.totalorder %s15_s7, %s76_s15  ;;  %p82_p5 = scmp.lt.s32.totalorder %s76_s15, %s76_s15 }
   0xb   :  { %p83_p6 = por %p82_p5, %p81_p4 }
   0xd   :  { %p84_p7 = pnand %p83_p6, %p77_p3 }
   0xf   :  { %87 = shalt.err (!%p84_p7)
}
  0x10   :  { %17 = dma.hbm_to_vmem [thread:$0]  %s153_s0, 128, %s15_s7, [#allocation3]  }
  0x11   :  { %110 = dma.done.wait [#allocation3], 128  }
  0x12   :  { %111 = vsyncadd [#allocation3], 4294967168  ;;  %vm22_vm0 = vcmask 261120   ;;  %v21_v0 = vld [vmem:[#allocation2] sm:$0xff]  ;;  %s115_s0 = smov [#allocation5]  }
  0x13   :  { %v23_v1 = vsel %vm22_vm0, %v21_v0, 0.0  ;;  %s53_s18 = sshll.u32 %s115_s0, 4  ;;  %s54_s18 = int_to_ptr.vmem [resolvable:$true] %s53_s18 }
  0x14   :  { %v24_v2 = vrot.slane %v23_v1, 4  ;;  %s88_s19 = scalar_lea.vmem %s54_s18, 128  ;;  %p93_p9 = scmp.lt.s32.totalorder %s54_s18, %s54_s18 }
  0x15   :  { %p89_p8 = scmp.ne.s32.totalorder %s54_s18, %s88_s19  ;;  %p94_p10 = scmp.lt.s32.totalorder %s88_s19, %s88_s19 }
  0x16   :  { %v25_v3 = vadd.f32 %v24_v2, %v23_v1 }
  0x17   :  { %p95_p11 = por %p94_p10, %p93_p9 }
  0x18   :  { %v26_v4 = vrot.slane %v25_v3, 2 }
  0x19   :  { %p96_p12 = pnand %p95_p11, %p89_p8 }
  0x1a   :  { %v27_v5 = vadd.f32 %v26_v4, %v25_v3 }
  0x1c   :  { %v28_v6 = vrot.slane %v27_v5, 1 }
  0x1e   :  { %v29_v7 = vadd.f32 %v28_v6, %v27_v5 }
  0x20   :  { %v31_v8 = vmul.f32 0.125, %v29_v7 }
  0x22   :  { %v32_v9 = vsub.f32 %v21_v0, %v31_v8 }
  0x24   :  { %v33_v10 = vmul.f32 %v32_v9, %v32_v9 }
  0x26   :  { %v34_v11 = vsel %vm22_vm0, %v33_v10, 0.0 }
  0x27   :  { %v35_v12 = vrot.slane %v34_v11, 4 }
  0x29   :  { %v36_v13 = vadd.f32 %v35_v12, %v34_v11 }
  0x2b   :  { %v37_v14 = vrot.slane %v36_v13, 2 }
  0x2d   :  { %v38_v15 = vadd.f32 %v37_v14, %v36_v13 }
  0x2f   :  { %v39_v16 = vrot.slane %v38_v15, 1 }
  0x31   :  { %v40_v17 = vadd.f32 %v39_v16, %v38_v15 }
  0x33   :  { %v41_v18 = vmul.f32 0.125, %v40_v17 }
  0x35   :  { %v42_v19 = vmul.f32 1.1428572, %v41_v18 }
  0x37   :  { %v43_v20 = vadd.f32 1e-07, %v42_v19 }
  0x39   :  { %64 = vrsqrt.f32 %v43_v20 }
  0x43   :  { %v65_v21 = vpop.eup %64 }
  0x44   :  { %v45_v22 = vmul.f32 %v65_v21, %v32_v9 }
  0x46   :  { %46 = vst.msk [vmem:[#allocation5] sm:$0xff] %vm22_vm0, %v45_v22 }
  0x47   :  { %99 = shalt.err (!%p96_p12)
}
  0x48   :  { %s100_s22 = scalar_lea.hbm %s154_s1, 128 }
  0x49   :  { %p101_p13 = scmp.ne.s32.totalorder %s154_s1, %s100_s22  ;;  %p104_p0 = scmp.lt.u32.totalorder %s100_s22, %s154_s1 }
  0x4b   :  { %p106_p1 = pnand %p104_p0, %p101_p13 }
  0x4d   :  { %109 = shalt.err (!%p106_p1)
}
  0x4e   :  { %56 = dma.vmem_to_hbm [thread:$0]  %s54_s18, 128, %s154_s1, [#allocation4]  }
  0x4f   :  { %112 = dma.done.wait [#allocation4], 128  }
  0x50   :  { %113 = vsyncadd [#allocation4], 4294967168 }
  0x51   :  { %60 = vsyncpa [#allocation3], 1 }
  0x52   :  { %61 = vsyncpa [#allocation4], 1 }

</bundles_post_ra>
